<compile_context>
chip_gen: v7x
topology: tpu7x:2x2x1
jax: 0.10.0
libtpu: 0.0.40
codegen_flags: <defaults>
</compile_context>

<pallas_src>
import functools

import jax
import jax.numpy as jnp
from jax.experimental import pallas as pl
from jax.experimental.pallas import tpu as pltpu

MARGIN = 0.2   # the module constructs nn.TripletMarginLoss(margin=0.2)
EPS = 1e-6     # F.pairwise_distance adds eps to the difference before taking the norm

TARGET_BLOCK_BYTES = 4 << 20   # target bytes per input streaming block
TEMP_BUDGET_BYTES = 4 << 20    # cap on live f32 compute temporaries per chunk
TEMP_FACTOR = 8                # ~number of f32 (chunk, D) temporaries live at once
MAX_CHUNK_ROWS = 1024          # upper bound on in-kernel compute chunk rows
MAX_CHUNKS_PER_TILE = 8        # keeps the fully-unrolled chunk loop small
HEADROOM_BYTES = 2 << 20


def _round_down(x, m):
    return (x // m) * m


def _triplet_loss_kernel(a_ref, p_ref, n_ref, o_ref, *, n_total, margin, eps, chunk):
    i = pl.program_id(0)
    tile_rows = a_ref.shape[0]
    num_chunks = tile_rows // chunk   # exact by construction in the wrapper

    def chunk_sum(c, acc):
        r0 = pl.multiple_of(c * chunk, chunk) if num_chunks > 1 else 0
        a = a_ref[pl.ds(r0, chunk), :].astype(jnp.float32)
        p = p_ref[pl.ds(r0, chunk), :].astype(jnp.float32)
        n = n_ref[pl.ds(r0, chunk), :].astype(jnp.float32)

        # d(x, y) = || x - y + eps ||_2   (matches nn.TripletMarginLoss / F.pairwise_distance)
        d_ap = jnp.sqrt(jnp.sum((a - p + eps) ** 2, axis=-1, keepdims=True))  # (chunk, 1)
        d_an = jnp.sqrt(jnp.sum((a - n + eps) ** 2, axis=-1, keepdims=True))  # (chunk, 1)
        per_sample = jnp.maximum(d_ap - d_an + margin, 0.0)                   # (chunk, 1)

        # Mask rows past the true batch size (ragged last tile).  jnp.where is a select,
        # so garbage/NaN in the padded region cannot leak into the sum.
        valid = n_total - i * tile_rows - r0
        row_idx = jax.lax.broadcasted_iota(jnp.int32, (chunk, 1), 0)
        per_sample = jnp.where(row_idx < valid, per_sample, 0.0)
        return acc + jnp.sum(per_sample)

    if num_chunks == 1:
        total = chunk_sum(0, jnp.float32(0.0))
    else:
        total = jax.lax.fori_loop(0, num_chunks, chunk_sum, jnp.float32(0.0), unroll=True)

    # Scalar partial sum into the (1,1) SMEM output block (no masked vector store).
    o_ref[0, 0] = total


def _pick_tiling(n_rows, d, itemsize, tile_n, chunk_rows=None):
    # Sublane packing: 8 rows for 32-bit, 16 for 16-bit, 32 for 8-bit dtypes.
    row_align = {4: 8, 2: 16, 1: 32}.get(itemsize, 8)
    row_bytes = d * itemsize

    # Generation-aware VMEM cap: never set vmem_limit_bytes above physical VMEM
    # (v7x has only 64 MiB per TensorCore; v5e/v6e have 128 MiB).
    try:
        phys_vmem = int(pltpu.get_tpu_info().vmem_capacity_bytes)
    except Exception:
        phys_vmem = 64 << 20   # conservative fallback = v7x
    vmem_cap = int(min((phys_vmem * 4) // 5, 100 << 20))

    # In-kernel compute chunk: bounds live f32 temporaries (upcasts / diffs / squares).
    if chunk_rows is None:
        chunk = TEMP_BUDGET_BYTES // max(TEMP_FACTOR * d * 4, 1)
        chunk = max(row_align, min(MAX_CHUNK_ROWS, _round_down(chunk, row_align)))
    else:
        chunk = max(row_align, _round_down(int(chunk_rows), row_align))
    temp_bytes = TEMP_FACTOR * chunk * d * 4

    # Streaming tile: sized by bytes (amortizes the ~0.35 us/grid-step overhead), bounded
    # by what fits under the VMEM cap (3 inputs x 2 pipeline buffers + temps) and by N.
    if tile_n is None:
        tile_n = max(1, TARGET_BLOCK_BYTES // max(row_bytes, 1))
    by_vmem = (vmem_cap - temp_bytes - HEADROOM_BYTES) // max(3 * 2 * row_bytes, 1)
    tile_n = max(1, min(tile_n, by_vmem, n_rows, MAX_CHUNKS_PER_TILE * chunk))

    if tile_n >= chunk:
        tile_n = _round_down(tile_n, chunk)          # exact chunk coverage in-kernel
    elif tile_n >= n_rows:
        chunk = tile_n                               # single full-extent tile (any size ok)
    else:
        tile_n = min(n_rows, max(row_align, _round_down(tile_n, row_align)))
        chunk = tile_n

    return tile_n, chunk, vmem_cap


def triplet_loss(anchor, positive, negative, *, tile_n=None, chunk_rows=None,
                 margin=MARGIN, eps=EPS):
    assert anchor.shape == positive.shape == negative.shape
    assert anchor.ndim == 2
    n_rows, d = anchor.shape
    itemsize = jnp.dtype(anchor.dtype).itemsize

    tile_n, chunk, vmem_limit = _pick_tiling(n_rows, d, itemsize, tile_n, chunk_rows)
    num_tiles = pl.cdiv(n_rows, tile_n)

    kernel = functools.partial(
        _triplet_loss_kernel, n_total=n_rows, margin=margin, eps=eps, chunk=chunk
    )

    in_spec = pl.BlockSpec((tile_n, d), lambda i: (i, 0))
    # SMEM output: one f32 scalar partial sum per grid step.
    out_spec = pl.BlockSpec((1, 1), lambda i: (i, 0),
                            memory_space=pltpu.MemorySpace.SMEM)

    cost = pl.CostEstimate(
        flops=8 * n_rows * d,
        transcendentals=2 * n_rows,
        bytes_accessed=3 * n_rows * d * itemsize + 4 * num_tiles,
    )

    partials = pl.pallas_call(
        kernel,
        grid=(num_tiles,),
        in_specs=[in_spec, in_spec, in_spec],
        out_specs=out_spec,
        out_shape=jax.ShapeDtypeStruct((num_tiles, 1), jnp.float32),
        compiler_params=pltpu.CompilerParams(
            dimension_semantics=("parallel",),   # megacore split on v7x; no-op on v5e/v6e
            vmem_limit_bytes=vmem_limit,         # always <= physical VMEM
        ),
        cost_estimate=cost,
    )(anchor, positive, negative)

    # reduction='mean' over the true batch size (exact, independent of tiling).
    return jnp.sum(partials) / n_rows


def _ref_loss(a, p, n, margin=MARGIN, eps=EPS):
    a = a.astype(jnp.float32)
    p = p.astype(jnp.float32)
    n = n.astype(jnp.float32)
    d_ap = jnp.sqrt(jnp.sum((a - p + eps) ** 2, axis=-1))
    d_an = jnp.sqrt(jnp.sum((a - n + eps) ** 2, axis=-1))
    return jnp.mean(jnp.maximum(d_ap - d_an + margin, 0.0))


if __name__ == "__main__":
    key = jax.random.PRNGKey(0)
    k1, k2, k3 = jax.random.split(key, 3)

    # Base case: small batch of embeddings, default byte-sized tiling (single tile).
    N, D = 20, 128
    anchor = jax.random.normal(k1, (N, D), dtype=jnp.float32)
    positive = jax.random.normal(k2, (N, D), dtype=jnp.float32)
    negative = jax.random.normal(k3, (N, D), dtype=jnp.float32)

    loss = triplet_loss(anchor, positive, negative)
    jax.block_until_ready(loss)
    ref = _ref_loss(anchor, positive, negative)
    assert jnp.allclose(loss, ref, atol=1e-5), (loss, ref)

    # Ragged multi-tile path: 3 grid steps, last tile partially masked.
    loss_t = triplet_loss(anchor, positive, negative, tile_n=8)
    jax.block_until_ready(loss_t)
    assert jnp.allclose(loss_t, ref, atol=1e-5), (loss_t, ref)

    # Multi-chunk in-kernel loop + ragged last tile (tile=32 rows, 4 chunks of 8).
    k4, k5, k6 = jax.random.split(jax.random.PRNGKey(1), 3)
    N2 = 40
    a2 = jax.random.normal(k4, (N2, D), dtype=jnp.float32)
    p2 = jax.random.normal(k5, (N2, D), dtype=jnp.float32)
    n2 = jax.random.normal(k6, (N2, D), dtype=jnp.float32)
    loss2 = triplet_loss(a2, p2, n2, tile_n=32, chunk_rows=8)
    jax.block_until_ready(loss2)
    ref2 = _ref_loss(a2, p2, n2)
    assert jnp.allclose(loss2, ref2, atol=1e-5), (loss2, ref2)

    # bf16 streaming path: halve HBM bytes, accumulate in f32 inside the kernel.
    a16 = anchor[:16].astype(jnp.bfloat16)
    p16 = positive[:16].astype(jnp.bfloat16)
    n16 = negative[:16].astype(jnp.bfloat16)
    loss16 = triplet_loss(a16, p16, n16)
    jax.block_until_ready(loss16)
    ref16 = _ref_loss(a16, p16, n16)
    assert jnp.allclose(loss16, ref16, atol=1e-4), (loss16, ref16)

    print("KERNEL_OK")
</pallas_src>

<mosaic_0001>
module attributes {stable_mosaic.version = 11 : i64} {
  func.func @_triplet_loss_kernel(%arg0: i32, %arg1: memref<20x128xf32, #tpu.memory_space<vmem>>, %arg2: memref<20x128xf32, #tpu.memory_space<vmem>>, %arg3: memref<20x128xf32, #tpu.memory_space<vmem>>, %arg4: memref<1x1xf32, #tpu.memory_space<smem>>) attributes {dimension_semantics = [#tpu.dimension_semantics<parallel>], iteration_bounds = array<i64: 1>, scalar_prefetch = 0 : i64, scratch_operands = 0 : i64, tpu.core_type = #tpu.core_type<tc>, window_params = [{transform_indices = @transform_0, window_bounds = array<i64: 20, 128>}, {transform_indices = @transform_1, window_bounds = array<i64: 20, 128>}, {transform_indices = @transform_2, window_bounds = array<i64: 20, 128>}, {transform_indices = @transform_3, window_bounds = array<i64: 1, 1>}]} {
    %c0 = arith.constant 0 : index
    %c0_0 = arith.constant 0 : index
    %0 = vector.load %arg1[%c0, %c0_0] : memref<20x128xf32, #tpu.memory_space<vmem>>, vector<20x128xf32>
    %c0_1 = arith.constant 0 : index
    %c0_2 = arith.constant 0 : index
    %1 = vector.load %arg2[%c0_1, %c0_2] : memref<20x128xf32, #tpu.memory_space<vmem>>, vector<20x128xf32>
    %c0_3 = arith.constant 0 : index
    %c0_4 = arith.constant 0 : index
    %2 = vector.load %arg3[%c0_3, %c0_4] : memref<20x128xf32, #tpu.memory_space<vmem>>, vector<20x128xf32>
    %3 = arith.subf %0, %1 : vector<20x128xf32>
    %cst = arith.constant 9.99999997E-7 : f32
    %4 = vector.broadcast %cst : f32 to vector<20x128xf32>
    %5 = arith.addf %3, %4 : vector<20x128xf32>
    %6 = arith.mulf %5, %5 : vector<20x128xf32>
    %cst_5 = arith.constant dense<0.000000e+00> : vector<20xf32>
    %7 = vector.multi_reduction <add>, %6, %cst_5 [1] : vector<20x128xf32> to vector<20xf32>
    %8 = vector.shape_cast %7 : vector<20xf32> to vector<20x1xf32>
    %9 = math.sqrt %8 : vector<20x1xf32>
    %10 = arith.subf %0, %2 : vector<20x128xf32>
    %cst_6 = arith.constant 9.99999997E-7 : f32
    %11 = vector.broadcast %cst_6 : f32 to vector<20x128xf32>
    %12 = arith.addf %10, %11 : vector<20x128xf32>
    %13 = arith.mulf %12, %12 : vector<20x128xf32>
    %cst_7 = arith.constant dense<0.000000e+00> : vector<20xf32>
    %14 = vector.multi_reduction <add>, %13, %cst_7 [1] : vector<20x128xf32> to vector<20xf32>
    %15 = vector.shape_cast %14 : vector<20xf32> to vector<20x1xf32>
    %16 = math.sqrt %15 : vector<20x1xf32>
    %17 = arith.subf %9, %16 : vector<20x1xf32>
    %cst_8 = arith.constant 2.000000e-01 : f32
    %18 = vector.broadcast %cst_8 : f32 to vector<20x1xf32>
    %19 = arith.addf %17, %18 : vector<20x1xf32>
    %cst_9 = arith.constant 0.000000e+00 : f32
    %20 = vector.broadcast %cst_9 : f32 to vector<20x1xf32>
    %21 = arith.maximumf %19, %20 : vector<20x1xf32>
    %c20_i32 = arith.constant 20 : i32
    %22 = arith.muli %arg0, %c20_i32 : i32
    %c20_i32_10 = arith.constant 20 : i32
    %23 = arith.subi %c20_i32_10, %22 : i32
    %c0_i32 = arith.constant 0 : i32
    %24 = arith.subi %23, %c0_i32 : i32
    %25 = tpu.iota {dimensions = array<i32: 0>} : vector<20x1xi32>
    %26 = vector.broadcast %24 : i32 to vector<20x1xi32>
    %27 = arith.cmpi slt, %25, %26 : vector<20x1xi32>
    %cst_11 = arith.constant 0.000000e+00 : f32
    %28 = vector.broadcast %cst_11 : f32 to vector<20x1xf32>
    %29 = arith.select %27, %21, %28 : vector<20x1xi1>, vector<20x1xf32>
    %30 = vector.shape_cast %29 : vector<20x1xf32> to vector<1x20x1xf32>
    %cst_12 = arith.constant dense<0.000000e+00> : vector<1xf32>
    %31 = vector.multi_reduction <add>, %30, %cst_12 [1, 2] : vector<1x20x1xf32> to vector<1xf32>
    %32 = vector.shape_cast %31 : vector<1xf32> to vector<1x1x1xf32>
    %33 = vector.extract %32[0, 0, 0] : f32 from vector<1x1x1xf32>
    %cst_13 = arith.constant 0.000000e+00 : f32
    %34 = arith.addf %cst_13, %33 : f32
    %c0_14 = arith.constant 0 : index
    %c0_15 = arith.constant 0 : index
    %35 = memref.load %arg4[%c0_14, %c0_15] : memref<1x1xf32, #tpu.memory_space<smem>>
    memref.store %34, %arg4[%c0_14, %c0_15] : memref<1x1xf32, #tpu.memory_space<smem>>
    return
  }
  func.func @transform_0(%arg0: i32) -> (i32, i32) {
    %c0_i32 = arith.constant 0 : i32
    %c0_i32_0 = arith.constant 0 : i32
    return %arg0, %c0_i32 : i32, i32
  }
  func.func @transform_1(%arg0: i32) -> (i32, i32) {
    %c0_i32 = arith.constant 0 : i32
    %c0_i32_0 = arith.constant 0 : i32
    return %arg0, %c0_i32 : i32, i32
  }
  func.func @transform_2(%arg0: i32) -> (i32, i32) {
    %c0_i32 = arith.constant 0 : i32
    %c0_i32_0 = arith.constant 0 : i32
    return %arg0, %c0_i32 : i32, i32
  }
  func.func @transform_3(%arg0: i32) -> (i32, i32) {
    %c0_i32 = arith.constant 0 : i32
    %c0_i32_0 = arith.constant 0 : i32
    return %arg0, %c0_i32 : i32, i32
  }
}

</mosaic_0001>

<bundles_post_ra>
// kernel: tpu_custom_call.1
= control target key start
LH: loop header
LB: loop body
LE: loop exit
PB: predicated region body
PF: predicated region fallthrough
CT: control target
= control target key end

     0   :  { %8 = vsyncpa [#allocation3], 0  ;;  %s388_s0 = inlined_call_operand.hbm [shape: f32[20,128], index: 0, kind: input, shape index: {}]   ;;  %s389_s1 = inlined_call_operand.hbm [shape: f32[20,128], index: 1, kind: input, shape index: {}]   ;;  %s390_s2 = inlined_call_operand.hbm [shape: f32[20,128], index: 2, kind: input, shape index: {}]   ;;  %s391_s3 = inlined_call_operand.hbm [shape: f32[1,1], index: 3, kind: output, shape index: {}]  }
   0x1   :  { %9 = vsyncpa [#allocation6], 0 }
   0x2   :  { %10 = vsyncpa [#allocation4], 0  ;;  %s298_s12 = smov [#allocation5]   ;;  %s299_s14 = smov [#allocation2]  }
   0x3   :  { %s28_s13 = sshll.u32 %s298_s12, 4  ;;  %s16_s15 = sshll.u32 %s299_s14, 4  ;;  %s29_s13 = int_to_ptr.vmem [resolvable:$true] %s28_s13  ;;  %s324_s15 = int_to_ptr.vmem [resolvable:$true] %s16_s15 }
   0x4   :  { %s216_s18 = scalar_lea.hbm %s389_s1, 384 }
   0x5   :  { %p217_p0 = scmp.ne.s32.totalorder %s389_s1, %s216_s18  ;;  %p220_p1 = scmp.lt.u32.totalorder %s216_s18, %s389_s1 }
   0x7   :  { %p222_p2 = pnand %p220_p1, %p217_p0 }
   0x9   :  { %225 = shalt.err (!%p222_p2)
}
   0xa   :  { %s226_s23 = scalar_lea.vmem %s29_s13, 384  ;;  %p231_p4 = scmp.lt.s32.totalorder %s29_s13, %s29_s13 }
   0xb   :  { %p227_p3 = scmp.ne.s32.totalorder %s29_s13, %s226_s23  ;;  %p232_p5 = scmp.lt.s32.totalorder %s226_s23, %s226_s23 }
   0xd   :  { %p233_p6 = por %p232_p5, %p231_p4 }
   0xf   :  { %p234_p7 = pnand %p233_p6, %p227_p3 }
  0x11   :  { %237 = shalt.err (!%p234_p7)
}
  0x12   :  { %s300_s24 = smov 128   ;;  %s301_s25 = smov 8  }
  0x13   :  { %34 = dma.hbm_to_vmem [thread:$0]  %s389_s1, 384, %s29_s13, [#allocation6], %s300_s24, %s300_s24, %s301_s25  }
  0x14   :  { %s238_s30 = scalar_lea.hbm %s388_s0, 384 }
  0x15   :  { %p239_p8 = scmp.ne.s32.totalorder %s388_s0, %s238_s30  ;;  %p242_p9 = scmp.lt.u32.totalorder %s238_s30, %s388_s0 }
  0x17   :  { %p244_p10 = pnand %p242_p9, %p239_p8 }
  0x19   :  { %247 = shalt.err (!%p244_p10)
}
  0x1a   :  { %s248_s8 = scalar_lea.vmem %s324_s15, 384  ;;  %p253_p12 = scmp.lt.s32.totalorder %s324_s15, %s324_s15 }
  0x1b   :  { %p249_p11 = scmp.ne.s32.totalorder %s324_s15, %s248_s8  ;;  %p254_p13 = scmp.lt.s32.totalorder %s248_s8, %s248_s8 }
  0x1d   :  { %p255_p0 = por %p254_p13, %p253_p12 }
  0x1f   :  { %p256_p1 = pnand %p255_p0, %p249_p11 }
  0x21   :  { %259 = shalt.err (!%p256_p1)
}
  0x22   :  { %22 = dma.hbm_to_vmem [thread:$0]  %s388_s0, 384, %s324_s15, [#allocation3], %s300_s24, %s300_s24, %s301_s25  }
  0x23   :  { %s302_s10 = smov [#allocation7]   ;;  %s260_s14 = scalar_lea.hbm %s390_s2, 384 }
  0x24   :  { %s40_s11 = sshll.u32 %s302_s10, 4  ;;  %p261_p2 = scmp.ne.s32.totalorder %s390_s2, %s260_s14  ;;  %s41_s11 = int_to_ptr.vmem [resolvable:$true] %s40_s11 }
  0x25   :  { %p264_p3 = scmp.lt.u32.totalorder %s260_s14, %s390_s2 }
  0x27   :  { %p266_p4 = pnand %p264_p3, %p261_p2 }
  0x29   :  { %269 = shalt.err (!%p266_p4)
}
  0x2a   :  { %s270_s20 = scalar_lea.vmem %s41_s11, 384  ;;  %p275_p6 = scmp.lt.s32.totalorder %s41_s11, %s41_s11 }
  0x2b   :  { %p271_p5 = scmp.ne.s32.totalorder %s41_s11, %s270_s20  ;;  %p276_p7 = scmp.lt.s32.totalorder %s270_s20, %s270_s20 }
  0x2d   :  { %p277_p8 = por %p276_p7, %p275_p6 }
  0x2f   :  { %p278_p9 = pnand %p277_p8, %p271_p5 }
  0x31   :  { %281 = shalt.err (!%p278_p9)
}
  0x32   :  { %46 = dma.hbm_to_vmem [thread:$0]  %s390_s2, 384, %s41_s11, [#allocation6], %s300_s24, %s300_s24, %s301_s25  }
  0x33   :  { %292 = dma.done.wait [#allocation3], 384  }
  0x34   :  { %293 = vsyncadd [#allocation3], 4294966912 }
  0x35   :  { %294 = dma.done.wait [#allocation6], 768  }
  0x36   :  { %295 = vsyncadd [#allocation6], 4294966528  ;;  %v56_v0 = vld [vmem:[#allocation2] sm:$0xff]  ;;  %v62_v1 = vld [vmem:[#allocation7] sm:$0xff]  ;;  %vm78_vm0 = vcmask 1043456   ;;  %v151_v48 = vlaneseq  ;;  %vm162_vm13 = vcmask 7168  }
  0x37   :  { %v59_v2 = vld [vmem:[#allocation5] sm:$0xff]  ;;  %v103_v3 = vsub.f32 %v56_v0, %v62_v1  ;;  %v57_v5 = vld [vmem:[#allocation2 + $0x8] sm:$0xff]  ;;  %v60_v7 = vld [vmem:[#allocation5 + $0x8] sm:$0xff]  ;;  %vm166_vm15 = vcmask 3072   ;;  %s282_s23 = scalar_lea.hbm %s391_s3, 16 }
  0x38   :  { %v65_v4 = vsub.f32 %v56_v0, %v59_v2  ;;  %v63_v6 = vld [vmem:[#allocation7 + $0x8] sm:$0xff]  ;;  %v66_v9 = vsub.f32 %v57_v5, %v60_v7  ;;  %v58_v10 = vld [vmem:[#allocation2 + $0x10] sm:$0xf]  ;;  %v64_v11 = vld [vmem:[#allocation7 + $0x10] sm:$0xf]  ;;  %v152_v60 = vshrl.u32 %v151_v48, 7  ;;  %p283_p10 = scmp.ne.s32.totalorder %s391_s3, %s282_s23  ;;  %p286_p11 = scmp.lt.u32.totalorder %s282_s23, %s391_s3 }
  0x39   :  { %v104_v8 = vsub.f32 %v57_v5, %v63_v6  ;;  %v61_v12 = vld [vmem:[#allocation5 + $0x10] sm:$0xf]  ;;  %v106_v13 = vadd.f32 1e-06, %v103_v3  ;;  %v105_v15 = vsub.f32 %v58_v10, %v64_v11 }
  0x3a   :  { %v68_v14 = vadd.f32 1e-06, %v65_v4  ;;  %v67_v16 = vsub.f32 %v58_v10, %v61_v12  ;;  %v69_v18 = vadd.f32 1e-06, %v66_v9  ;;  %v154_v7 = vadd.s32 16, %v152_v60  ;;  %p288_p12 = pnand %p286_p11, %p283_p10 }
  0x3b   :  { %v107_v17 = vadd.f32 1e-06, %v104_v8  ;;  %v109_v19 = vmul.f32 %v106_v13, %v106_v13  ;;  %v108_v21 = vadd.f32 1e-06, %v105_v15 }
  0x3c   :  { %v71_v20 = vmul.f32 %v68_v14, %v68_v14  ;;  %v70_v22 = vadd.f32 1e-06, %v67_v16  ;;  %v72_v24 = vmul.f32 %v69_v18, %v69_v18  ;;  %vm158_vm14 = vcmp.lt.s32.totalorder %v154_v7, 20 }
  0x3d   :  { %112 = vadd.xlane.f32.xlu1 %v109_v19  ;;  %v110_v23 = vmul.f32 %v107_v17, %v107_v17  ;;  %v111_v25 = vmul.f32 %v108_v21, %v108_v21 }
  0x3e   :  { %74 = vadd.xlane.f32.xlu0 %v71_v20  ;;  %v73_v26 = vmul.f32 %v70_v22, %v70_v22 }
  0x3f   :  { %v116_v27 = vsel %vm78_vm0, %v111_v25, 0.0 }
  0x40   :  { %v79_v28 = vsel %vm78_vm0, %v73_v26, 0.0 }
  0x41   :  { %114 = vadd.xlane.f32.xlu1 %v110_v23 }
  0x42   :  { %76 = vadd.xlane.f32.xlu0 %v72_v24 }
  0x45   :  { %117 = vadd.xlane.f32.xlu1 %v116_v27 }
  0x46   :  { %80 = vadd.xlane.f32.xlu0 %v79_v28 }
  0xca   :  { %v113_v29 = vpop.xlane.xlu1 %112 }
  0xcb   :  { %v75_v30 = vpop.xlane.xlu0 %74  ;;  %204 = vrsqrt.f32 %v113_v29  ;;  %vm121_vm1 = vcmp.eq.f32.partialorder %v113_v29, inf  ;;  %v124_v38 = vand.u32 2147483648, %v113_v29  ;;  %vm123_vm3 = vcmp.eq.f32.partialorder %v113_v29, 0.0 }
  0xcc   :  { %206 = vrsqrt.f32 %v75_v30  ;;  %vm84_vm2 = vcmp.eq.f32.partialorder %v75_v30, inf  ;;  %v87_v40 = vand.u32 2147483648, %v75_v30  ;;  %vm86_vm4 = vcmp.eq.f32.partialorder %v75_v30, 0.0 }
  0xce   :  { %v115_v31 = vpop.xlane.xlu1 %114 }
  0xcf   :  { %v77_v32 = vpop.xlane.xlu0 %76  ;;  %208 = vrsqrt.f32 %v115_v31  ;;  %vm128_vm5 = vcmp.eq.f32.partialorder %v115_v31, inf  ;;  %v131_v49 = vand.u32 2147483648, %v115_v31  ;;  %vm130_vm7 = vcmp.eq.f32.partialorder %v115_v31, 0.0 }
  0xd0   :  { %210 = vrsqrt.f32 %v77_v32  ;;  %vm91_vm6 = vcmp.eq.f32.partialorder %v77_v32, inf  ;;  %v94_v51 = vand.u32 2147483648, %v77_v32  ;;  %vm93_vm8 = vcmp.eq.f32.partialorder %v77_v32, 0.0 }
  0xd2   :  { %v118_v33 = vpop.xlane.xlu1 %117 }
  0xd3   :  { %v81_v34 = vpop.xlane.xlu0 %80  ;;  %212 = vrsqrt.f32 %v118_v33  ;;  %vm135_vm9 = vcmp.eq.f32.partialorder %v118_v33, inf  ;;  %vm137_vm10 = vcmp.eq.f32.partialorder %v118_v33, 0.0  ;;  %v138_v61 = vand.u32 2147483648, %v118_v33 }
  0xd4   :  { %214 = vrsqrt.f32 %v81_v34  ;;  %vm98_vm11 = vcmp.eq.f32.partialorder %v81_v34, inf  ;;  %v101_v1 = vand.u32 2147483648, %v81_v34  ;;  %vm100_vm12 = vcmp.eq.f32.partialorder %v81_v34, 0.0 }
  0xd5   :  { %v205_v35 = vpop.eup %204 }
  0xd6   :  { %v207_v36 = vpop.eup %206  ;;  %v120_v37 = vmul.f32 %v205_v35, %v113_v29 }
  0xd7   :  { %v83_v39 = vmul.f32 %v207_v36, %v75_v30 }
  0xd8   :  { %v122_v41 = vsel %vm121_vm1, %v113_v29, %v120_v37 }
  0xd9   :  { %v209_v42 = vpop.eup %208  ;;  %v85_v43 = vsel %vm84_vm2, %v75_v30, %v83_v39  ;;  %v125_v44 = vsel %vm123_vm3, %v124_v38, %v122_v41 }
  0xda   :  { %v211_v45 = vpop.eup %210  ;;  %v127_v46 = vmul.f32 %v209_v42, %v115_v31  ;;  %v88_v47 = vsel %vm86_vm4, %v87_v40, %v85_v43 }
  0xdb   :  { %v90_v50 = vmul.f32 %v211_v45, %v77_v32  ;;  %v140_v53 = vsub.f32 %v88_v47, %v125_v44 }
  0xdc   :  { %v129_v52 = vsel %vm128_vm5, %v115_v31, %v127_v46 }
  0xdd   :  { %v213_v54 = vpop.eup %212  ;;  %v92_v55 = vsel %vm91_vm6, %v77_v32, %v90_v50  ;;  %v132_v56 = vsel %vm130_vm7, %v131_v49, %v129_v52  ;;  %v143_v2 = vadd.f32 0.2, %v140_v53 }
  0xde   :  { %v215_v57 = vpop.eup %214  ;;  %v134_v58 = vmul.f32 %v213_v54, %v118_v33  ;;  %v95_v59 = vsel %vm93_vm8, %v94_v51, %v92_v55 }
  0xdf   :  { %v97_v62 = vmul.f32 %v215_v57, %v81_v34  ;;  %v141_v63 = vsub.f32 %v95_v59, %v132_v56  ;;  %v146_v10 = vmax.f32 %v143_v2, 0.0 }
  0xe0   :  { %v136_v0 = vsel %vm135_vm9, %v118_v33, %v134_v58 }
  0xe1   :  { %v99_v3 = vsel %vm98_vm11, %v81_v34, %v97_v62  ;;  %v139_v4 = vsel %vm137_vm10, %v138_v61, %v136_v0  ;;  %v144_v5 = vadd.f32 0.2, %v141_v63  ;;  %v163_v14 = vsel %vm162_vm13, %v146_v10, 0.0 }
  0xe2   :  { %v102_v6 = vsel %vm100_vm12, %v101_v1, %v99_v3 }
  0xe3   :  { %v142_v8 = vsub.f32 %v102_v6, %v139_v4  ;;  %v147_v9 = vmax.f32 %v144_v5, 0.0 }
  0xe5   :  { %v145_v11 = vadd.f32 0.2, %v142_v8  ;;  %v164_v12 = vsel %vm162_vm13, %v147_v9, 0.0 }
  0xe6   :  { %v165_v16 = vadd.f32 %v164_v12, %v163_v14 }
  0xe7   :  { %v148_v13 = vmax.f32 %v145_v11, 0.0 }
  0xe9   :  { %v161_v15 = vsel %vm158_vm14, %v148_v13, 0.0 }
  0xea   :  { %v167_v17 = vsel %vm166_vm15, %v161_v15, 0.0 }
  0xeb   :  { %v168_v18 = vadd.f32 %v167_v17, %v165_v16 }
  0xed   :  { %169 = vadd.xlane.f32.xlu0 %v168_v18 }
 0x17a   :  { %v170_v19 = vpop.xlane.xlu0 %169 }
 0x17b   :  { %v171_v20 = vrot.slane %v170_v19, 4 }
 0x17d   :  { %v172_v21 = vadd.f32 %v171_v20, %v170_v19 }
 0x17f   :  { %v173_v22 = vrot.slane %v172_v21, 2 }
 0x181   :  { %v174_v23 = vadd.f32 %v173_v22, %v172_v21 }
 0x183   :  { %v175_v24 = vrot.slane %v174_v23, 1 }
 0x185   :  { %v176_v25 = vadd.f32 %v175_v24, %v174_v23 }
 0x187   :  { %196 = vpush %v176_v25 }
 0x1b8   :  { %s197_s2 = spop %196 }
 0x1b9   :  { %180 = sst [smem:[#allocation8]] %s197_s2 }
 0x1ba   :  { %291 = shalt.err (!%p288_p12)
}
 0x1bb   :  { %s303_s28 = smov [#allocation8]  }
 0x1bc   :  { %188 = dma.smem_to_hbm %s303_s28, 16, %s391_s3, [#allocation4]  }
 0x1bd   :  { %296 = dma.done.wait [#allocation4], 16  }
 0x1be   :  { %297 = vsyncadd [#allocation4], 4294967280 }
 0x1bf   :  { %192 = sfence }
 0x1c0   :  { %193 = vsyncpa [#allocation3], 1 }
 0x1c1   :  { %194 = vsyncpa [#allocation6], 1 }
 0x1c2   :  { %195 = vsyncpa [#allocation4], 1 }

</bundles_post_ra>
